<compile_context>
chip_gen: v7x
topology: tpu7x:2x2x1
jax: 0.10.0
libtpu: 0.0.40
codegen_flags: <defaults>
</compile_context>

<pallas_src>
import jax
import jax.numpy as jnp
from jax.experimental import pallas as pl
from jax.experimental.pallas import tpu as pltpu


def _round_up(x, m):
    return ((x + m - 1) // m) * m


def mean_encoder_kernel(counts_ref, table_ref, invlen_ref, out_ref, acc_ref):
    # counts_ref: VMEM [B_pad, tv]  f32  multi-hot token counts (current V tile)
    # table_ref:  VMEM [tv,   td]   f32  embedding-table tile
    # invlen_ref: VMEM [B_pad, 1]   f32  1 / lengths
    # out_ref:    VMEM [B_pad, td]  f32  memory_bank tile (resident across V axis)
    # acc_ref:    VMEM [B_pad, td]  f32  accumulator scratch
    v = pl.program_id(1)  # V (vocab) reduction axis — last grid axis

    @pl.when(v == 0)
    def _init():
        acc_ref[...] = jnp.zeros_like(acc_ref)

    # One fat (B_pad, tv) @ (tv, td) matmul per tile pair on the MXU.
    acc_ref[...] += jnp.dot(
        counts_ref[...], table_ref[...], preferred_element_type=jnp.float32
    )

    @pl.when(v == pl.num_programs(1) - 1)
    def _finalize():
        # torch.div(emb.sum(0), lengths.view(B, 1).float())  ==  acc * (1/len)
        out_ref[...] = (acc_ref[...] * invlen_ref[...]).astype(out_ref.dtype)


def mean_encoder(src, lengths, embedding_table, *, tv=512, td=512):
    """src: [S, B] int token ids (time-major), lengths: [B] int,
    embedding_table: [V, D] f32.
    Returns memory_bank: [B, D] f32 == (table[src]).sum(0) / lengths[:, None]
    """
    S, B = src.shape
    V, D = embedding_table.shape

    # Lane/sublane-dense padded shapes and tile sizes.
    B_pad = _round_up(B, 8)
    tv = min(tv, _round_up(V, 128))
    V_pad = _round_up(V, tv)
    td = min(td, _round_up(D, 128))
    D_pad = _round_up(D, td)

    # Multi-hot count matrix C[b, v] = #{ s : src[s, b] == v }.
    # (table[src]).sum(0) == C @ table exactly (counts are small integers).
    batch_idx = jnp.broadcast_to(jnp.arange(B, dtype=jnp.int32)[None, :], (S, B))
    counts = jnp.zeros((B_pad, V_pad), jnp.float32)
    counts = counts.at[batch_idx.ravel(), src.astype(jnp.int32).ravel()].add(1.0)

    # Reciprocal lengths (padded batch rows get 1.0; they are sliced off below).
    inv_len = jnp.ones((B_pad, 1), jnp.float32)
    inv_len = inv_len.at[:B, 0].set(1.0 / lengths.astype(jnp.float32))

    # Zero-padded embedding table (padded vocab rows have zero counts anyway).
    table_pad = jnp.zeros((V_pad, D_pad), jnp.float32)
    table_pad = table_pad.at[:V, :D].set(embedding_table.astype(jnp.float32))

    grid = (D_pad // td, V_pad // tv)  # (parallel D tiles, reduction V tiles)

    grid_spec = pltpu.PrefetchScalarGridSpec(
        num_scalar_prefetch=0,
        grid=grid,
        in_specs=[
            pl.BlockSpec((B_pad, tv), lambda d, v: (0, v)),  # count-matrix V tile
            pl.BlockSpec((tv, td), lambda d, v: (v, d)),     # table tile (streamed)
            pl.BlockSpec((B_pad, 1), lambda d, v: (0, 0)),   # 1/lengths
        ],
        out_specs=pl.BlockSpec((B_pad, td), lambda d, v: (0, d)),
        scratch_shapes=[pltpu.VMEM((B_pad, td), jnp.float32)],
    )

    out_pad = pl.pallas_call(
        mean_encoder_kernel,
        out_shape=jax.ShapeDtypeStruct((B_pad, D_pad), jnp.float32),
        grid_spec=grid_spec,
        compiler_params=pltpu.CompilerParams(
            # D tiles are independent (megacore-shardable on v7x); V is the
            # reduction axis with the resident accumulator, kept last.
            dimension_semantics=("parallel", "arbitrary"),
        ),
    )(counts, table_pad, inv_len)

    return out_pad[:B, :D]


if __name__ == "__main__":
    # Small deterministic example: S=8 (max_word), B=2 (batch), V=64 vocab, D=32 emb dim.
    S, B, V, D = 8, 2, 64, 32
    key = jax.random.PRNGKey(0)
    k_src, k_tab = jax.random.split(key)

    src = jax.random.randint(k_src, (S, B), 0, V, dtype=jnp.int32)   # [S, B] time-major
    lengths = jnp.array([5, 8], dtype=jnp.int32)                      # [B]
    embedding_table = jax.random.normal(k_tab, (V, D), dtype=jnp.float32)

    out = mean_encoder(src, lengths, embedding_table)
    out = jax.block_until_ready(out)

    # Pure-JAX reference of the PyTorch forward semantics.
    ref = embedding_table[src].sum(0) / lengths.astype(jnp.float32)[:, None]
    assert out.shape == (B, D)
    assert jnp.allclose(out, ref, rtol=1e-5, atol=1e-5), "mismatch vs reference"

    print("KERNEL_OK")
</pallas_src>

<mosaic_0001>
module attributes {stable_mosaic.version = 11 : i64} {
  func.func @mean_encoder_kernel(%arg0: i32, %arg1: i32, %arg2: memref<8x128xf32, #tpu.memory_space<vmem>>, %arg3: memref<128x128xf32, #tpu.memory_space<vmem>>, %arg4: memref<8x1xf32, #tpu.memory_space<vmem>>, %arg5: memref<8x128xf32, #tpu.memory_space<vmem>>, %arg6: memref<8x128xf32, #tpu.memory_space<vmem>>) attributes {dimension_semantics = [#tpu.dimension_semantics<parallel>, #tpu.dimension_semantics<arbitrary>], iteration_bounds = array<i64: 1, 1>, scalar_prefetch = 0 : i64, scratch_operands = 1 : i64, tpu.core_type = #tpu.core_type<tc>, window_params = [{transform_indices = @transform_0, window_bounds = array<i64: 8, 128>}, {transform_indices = @transform_1, window_bounds = array<i64: 128, 128>}, {pipeline_mode = #tpu.pipeline_mode<synchronous>, transform_indices = @transform_2, window_bounds = array<i64: 8, 1>}, {transform_indices = @transform_3, window_bounds = array<i64: 8, 128>}]} {
    %c0_i32 = arith.constant 0 : i32
    %0 = arith.cmpi eq, %arg1, %c0_i32 : i32
    %1 = arith.extui %0 : i1 to i32
    %c0_i32_0 = arith.constant 0 : i32
    %2 = arith.cmpi ne, %1, %c0_i32_0 : i32
    scf.if %2 {
      %cst_10 = arith.constant 0.000000e+00 : f32
      %12 = vector.broadcast %cst_10 : f32 to vector<8x128xf32>
      %c0_11 = arith.constant 0 : index
      %c0_12 = arith.constant 0 : index
      %13 = vector.load %arg6[%c0_11, %c0_12] : memref<8x128xf32, #tpu.memory_space<vmem>>, vector<8x128xf32>
      tpu.vector_store %arg6[%c0_11, %c0_12], %12 {strides = array<i32>} : memref<8x128xf32, #tpu.memory_space<vmem>>, vector<8x128xf32>,
    } else {
    }
    %c0 = arith.constant 0 : index
    %c0_1 = arith.constant 0 : index
    %3 = vector.load %arg6[%c0, %c0_1] : memref<8x128xf32, #tpu.memory_space<vmem>>, vector<8x128xf32>
    %c0_2 = arith.constant 0 : index
    %c0_3 = arith.constant 0 : index
    %4 = vector.load %arg2[%c0_2, %c0_3] : memref<8x128xf32, #tpu.memory_space<vmem>>, vector<8x128xf32>
    %c0_4 = arith.constant 0 : index
    %c0_5 = arith.constant 0 : index
    %5 = vector.load %arg3[%c0_4, %c0_5] : memref<128x128xf32, #tpu.memory_space<vmem>>, vector<128x128xf32>
    %cst = arith.constant dense<0.000000e+00> : vector<8x128xf32>
    %6 = tpu.matmul %4, %5, %cst {dimension_numbers = #tpu.dot_dimension_numbers<[1], [0], [0], [1], [0, 0, 1, 1], [], []>} : vector<8x128xf32>, vector<128x128xf32>, vector<8x128xf32> -> vector<8x128xf32>
    %7 = arith.addf %3, %6 : vector<8x128xf32>
    %c0_6 = arith.constant 0 : index
    %c0_7 = arith.constant 0 : index
    %8 = vector.load %arg6[%c0_6, %c0_7] : memref<8x128xf32, #tpu.memory_space<vmem>>, vector<8x128xf32>
    tpu.vector_store %arg6[%c0_6, %c0_7], %7 {strides = array<i32>} : memref<8x128xf32, #tpu.memory_space<vmem>>, vector<8x128xf32>,
    %c0_i32_8 = arith.constant 0 : i32
    %9 = arith.cmpi eq, %arg1, %c0_i32_8 : i32
    %10 = arith.extui %9 : i1 to i32
    %c0_i32_9 = arith.constant 0 : i32
    %11 = arith.cmpi ne, %10, %c0_i32_9 : i32
    scf.if %11 {
      %c0_10 = arith.constant 0 : index
      %c0_11 = arith.constant 0 : index
      %12 = vector.load %arg6[%c0_10, %c0_11] : memref<8x128xf32, #tpu.memory_space<vmem>>, vector<8x128xf32>
      %c0_12 = arith.constant 0 : index
      %c0_13 = arith.constant 0 : index
      %13 = vector.load %arg4[%c0_12, %c0_13] : memref<8x1xf32, #tpu.memory_space<vmem>>, vector<8x1xf32>
      %14 = vector.broadcast %13 : vector<8x1xf32> to vector<8x128xf32>
      %15 = arith.mulf %12, %14 : vector<8x128xf32>
      %c0_14 = arith.constant 0 : index
      %c0_15 = arith.constant 0 : index
      %16 = vector.load %arg5[%c0_14, %c0_15] : memref<8x128xf32, #tpu.memory_space<vmem>>, vector<8x128xf32>
      tpu.vector_store %arg5[%c0_14, %c0_15], %15 {strides = array<i32>} : memref<8x128xf32, #tpu.memory_space<vmem>>, vector<8x128xf32>,
    } else {
    }
    return
  }
  func.func @transform_0(%arg0: i32, %arg1: i32) -> (i32, i32) {
    %c0_i32 = arith.constant 0 : i32
    %c0_i32_0 = arith.constant 0 : i32
    return %c0_i32, %arg1 : i32, i32
  }
  func.func @transform_1(%arg0: i32, %arg1: i32) -> (i32, i32) {
    %c0_i32 = arith.constant 0 : i32
    return %arg1, %arg0 : i32, i32
  }
  func.func @transform_2(%arg0: i32, %arg1: i32) -> (i32, i32) {
    %c0_i32 = arith.constant 0 : i32
    %c0_i32_0 = arith.constant 0 : i32
    %c0_i32_1 = arith.constant 0 : i32
    return %c0_i32, %c0_i32_0 : i32, i32
  }
  func.func @transform_3(%arg0: i32, %arg1: i32) -> (i32, i32) {
    %c0_i32 = arith.constant 0 : i32
    %c0_i32_0 = arith.constant 0 : i32
    return %c0_i32, %arg0 : i32, i32
  }
}

</mosaic_0001>

<bundles_post_ra>
// kernel: tpu_custom_call.1
= control target key start
LH: loop header
LB: loop body
LE: loop exit
PB: predicated region body
PF: predicated region fallthrough
CT: control target
= control target key end

     0   :  { %8 = vsyncpa [#allocation4], 0  ;;  %s342_s0 = inlined_call_operand.vmem [shape: f32[8,128], index: 0, kind: input, shape index: {}]   ;;  %s343_s1 = inlined_call_operand.hbm [shape: f32[128,128], index: 1, kind: input, shape index: {}]   ;;  %s344_s2 = inlined_call_operand.vmem [shape: f32[8,1], index: 2, kind: input, shape index: {}]   ;;  %s345_s3 = inlined_call_operand.hbm [shape: f32[8,128], index: 3, kind: output, shape index: {}]  }
   0x1   :  { %9 = vsyncpa [#allocation5], 0  ;;  %s284_s12 = smov [#allocation3]   ;;  %s236_s16 = scalar_lea.hbm %s343_s1, 2048 }
   0x2   :  { %s17_s13 = sshll.u32 %s284_s12, 4  ;;  %p237_p0 = scmp.ne.s32.totalorder %s343_s1, %s236_s16  ;;  %s18_s13 = int_to_ptr.vmem [resolvable:$true] %s17_s13 }
   0x3   :  { %p240_p1 = scmp.lt.u32.totalorder %s236_s16, %s343_s1 }
   0x5   :  { %p242_p2 = pnand %p240_p1, %p237_p0 }
   0x7   :  { %245 = shalt.err (!%p242_p2)
}
   0x8   :  { %s246_s21 = scalar_lea.vmem %s18_s13, 2048  ;;  %p251_p4 = scmp.lt.s32.totalorder %s18_s13, %s18_s13 }
   0x9   :  { %p247_p3 = scmp.ne.s32.totalorder %s18_s13, %s246_s21  ;;  %p252_p5 = scmp.lt.s32.totalorder %s246_s21, %s246_s21 }
   0xb   :  { %p253_p6 = por %p252_p5, %p251_p4 }
   0xd   :  { %p254_p7 = pnand %p253_p6, %p247_p3 }
   0xf   :  { %257 = shalt.err (!%p254_p7)
}
  0x10   :  { %s285_s22 = smov 128   ;;  %s286_s23 = smov 8  }
  0x11   :  { %23 = dma.hbm_to_vmem [thread:$0]  %s343_s1, 2048, %s18_s13, [#allocation4], %s285_s22, %s285_s22, %s286_s23  }
  0x12   :  { %280 = dma.done.wait [#allocation4], 2048  }
  0x13   :  { %281 = vsyncadd [#allocation4], 4294965248  ;;  %v287_v0 = vmov 0.0|0.0   ;;  %vm288_vm0 = vmmov 0   ;;  %v289_v1 = vmov 0.0   ;;  %v290_v2 = vmov 0  }
  0x14   :  { %203 = vmatprep.subr.bf16.mxu0 %v287_v0  ;;  %200 = vmatprep.mubr.msk.f32.mxu0 %vm288_vm0, %v289_v1  ;;  %v36_v3 = vld [vmem:[#allocation3] sm:$0xff]  ;;  %v37_v4 = vld [vmem:[#allocation3 + $0x8] sm:$0xff]  ;;  %v38_v5 = vld [vmem:[#allocation3 + $0x10] sm:$0xff]  ;;  %s291_s28 = smov [#allocation6]  }
  0x15   :  { %235 = vset.pattern.permute.xlu0 %v290_v2  ;;  %v204_v6 = vpack.c.bf16 %v37_v4, %v36_v3  ;;  %v39_v7 = vld [vmem:[#allocation3 + $0x18] sm:$0xff]  ;;  %v40_v9 = vld [vmem:[#allocation3 + $0x20] sm:$0xff]  ;;  %v41_v10 = vld [vmem:[#allocation3 + $0x28] sm:$0xff]  ;;  %s142_s29 = sshll.u32 %s291_s28, 4  ;;  %s143_s29 = int_to_ptr.vmem [resolvable:$true] %s142_s29 }
  0x16   :  { %v207_v8 = vpack.c.bf16 %v39_v7, %v38_v5  ;;  %v128_v11 = vld [vmem:[%s344_s2] sm:$0xff]  ;;  %v210_v12 = vpack.c.bf16 %v41_v10, %v40_v9  ;;  %v42_v13 = vld [vmem:[#allocation3 + $0x30] sm:$0xff]  ;;  %v43_v14 = vld [vmem:[#allocation3 + $0x38] sm:$0xff]  ;;  %s258_s30 = scalar_lea.vmem %s143_s29, 128  ;;  %p263_p9 = scmp.lt.s32.totalorder %s143_s29, %s143_s29 }
  0x17   :  { %205 = vmatpush3.bf16.msra.mxu0 %v204_v6  ;;  %131 = vperm.xlu0 %235, %v128_v11   ;;  %v213_v15 = vpack.c.bf16 %v43_v14, %v42_v13  ;;  %v44_v16 = vld [vmem:[#allocation3 + $0x40] sm:$0xff]  ;;  %v45_v17 = vld [vmem:[#allocation3 + $0x48] sm:$0xff]  ;;  %v46_v19 = vld [vmem:[#allocation3 + $0x50] sm:$0xff]  ;;  %p259_p8 = scmp.ne.s32.totalorder %s143_s29, %s258_s30  ;;  %p264_p10 = scmp.lt.s32.totalorder %s258_s30, %s258_s30 }
  0x18   :  { %206 = vmatprep.subr.bf16.mxu0 %v287_v0  ;;  %v216_v18 = vpack.c.bf16 %v45_v17, %v44_v16  ;;  %v47_v20 = vld [vmem:[#allocation3 + $0x58] sm:$0xff]  ;;  %v48_v22 = vld [vmem:[#allocation3 + $0x60] sm:$0xff]  ;;  %v49_v23 = vld [vmem:[#allocation3 + $0x68] sm:$0xff] }
  0x19   :  { %v219_v21 = vpack.c.bf16 %v47_v20, %v46_v19  ;;  %v222_v24 = vpack.c.bf16 %v49_v23, %v48_v22  ;;  %v50_v25 = vld [vmem:[#allocation3 + $0x70] sm:$0xff]  ;;  %v51_v26 = vld [vmem:[#allocation3 + $0x78] sm:$0xff]  ;;  %v35_v28 = vld [vmem:[%s342_s0] sm:$0xff]  ;;  %p265_p11 = por %p264_p10, %p263_p9 }
  0x1a   :  { %v225_v27 = vpack.c.bf16 %v51_v26, %v50_v25 }
  0x1b   :  { %208 = vmatpush3.bf16.msra.mxu0 %v207_v8  ;;  %p266_p12 = pnand %p265_p11, %p259_p8 }
  0x1c   :  { %209 = vmatprep.subr.bf16.mxu0 %v287_v0 }
  0x1f   :  { %211 = vmatpush3.bf16.msra.mxu0 %v210_v12 }
  0x20   :  { %212 = vmatprep.subr.bf16.mxu0 %v287_v0 }
  0x23   :  { %214 = vmatpush3.bf16.msra.mxu0 %v213_v15 }
  0x24   :  { %215 = vmatprep.subr.bf16.mxu0 %v287_v0 }
  0x27   :  { %217 = vmatpush3.bf16.msra.mxu0 %v216_v18 }
  0x28   :  { %218 = vmatprep.subr.bf16.mxu0 %v287_v0 }
  0x2b   :  { %220 = vmatpush3.bf16.msra.mxu0 %v219_v21 }
  0x2c   :  { %221 = vmatprep.subr.bf16.mxu0 %v287_v0 }
  0x2f   :  { %223 = vmatpush3.bf16.msra.mxu0 %v222_v24 }
  0x30   :  { %224 = vmatprep.subr.bf16.mxu0 %v287_v0 }
  0x33   :  { %226 = vmatpush3.bf16.msra.mxu0 %v225_v27 }
  0x36   :  { %201 = vmatmul.mubr.f32.vlgmr.msra.gmra.mrb[0].mxu0 %v35_v28 }
  0x96   :  { %v132_v29 = vpop.permute.xlu0 %131 }
 0x109   :  { %v118_v30 = vpop.f32.mrb[0].mxu0 }
 0x10a   :  { %v134_v31 = vmul.f32 %v132_v29, %v118_v30  ;;  %v202_v32 = vpop.f32.mrb[1].mxu0 }
 0x10c   :  { %135 = vst [vmem:[#allocation6] sm:$0xff] %v134_v31 }
 0x10d   :  { %269 = shalt.err (!%p266_p12)
}
 0x10e   :  { %s270_s0 = scalar_lea.hbm %s345_s3, 128 }
 0x10f   :  { %p271_p13 = scmp.ne.s32.totalorder %s345_s3, %s270_s0  ;;  %p274_p0 = scmp.lt.u32.totalorder %s270_s0, %s345_s3 }
 0x111   :  { %p276_p1 = pnand %p274_p0, %p271_p13 }
 0x113   :  { %279 = shalt.err (!%p276_p1)
}
 0x114   :  { %145 = dma.vmem_to_hbm [thread:$0]  %s143_s29, 128, %s345_s3, [#allocation5]  }
 0x115   :  { %282 = dma.done.wait [#allocation5], 128  }
 0x116   :  { %283 = vsyncadd [#allocation5], 4294967168 }
 0x117   :  { %149 = vsyncpa [#allocation4], 1 }
 0x118   :  { %150 = vsyncpa [#allocation5], 1 }

</bundles_post_ra>
